<compile_context>
chip_gen: v7x
topology: tpu7x:2x2x1
jax: 0.10.0
libtpu: 0.0.40
codegen_flags: <defaults>
</compile_context>

<pallas_src>
import functools

import jax
import jax.numpy as jnp
from jax.experimental import pallas as pl
from jax.experimental.pallas import tpu as pltpu


# ----------------------------------------------------------------------------
# Hardware introspection (best-effort, trace time)
# ----------------------------------------------------------------------------
def _tpu_hw_info():
    """Returns (vmem_capacity_bytes, num_tensorcores) with safe fallbacks."""
    vmem = 64 << 20          # conservative default (v7x per-core VMEM)
    cores = 1
    try:
        info = pltpu.get_tpu_info()
        v = getattr(info, "vmem_capacity_bytes", None)
        if v:
            vmem = int(v)
        c = None
        for name in ("num_tensorcores", "tensorcores_per_chip", "num_cores", "core_count"):
            c = getattr(info, name, None)
            if c:
                break
        if c:
            cores = int(c)
        elif v:
            # v7x is the generation with <=64 MiB per-core VMEM and 2 TCs per chip.
            cores = 2 if int(v) <= (64 << 20) else 1
    except Exception:
        pass
    return int(vmem), int(cores)


# ----------------------------------------------------------------------------
# Kernels
# ----------------------------------------------------------------------------
def grn_fused_kernel(x_ref, gamma_ref, beta_ref, o_ref):
    # One batch element per grid step: x_ref is (1, C, HW), gamma/beta are (1, C, 1) f32.
    xf = x_ref[...].astype(jnp.float32)
    ss = jnp.sum(xf * xf, axis=-1, keepdims=True)               # (1, C, 1) lane reduce
    gx = jnp.sqrt(ss)
    nx = gx / (jnp.mean(gx, axis=1, keepdims=True) + 1e-6)      # sublane mean
    scale = gamma_ref[...] * nx + 1.0                           # fused affine
    beta = beta_ref[...]
    # Re-read x for the apply so the f32 upcast slab does not need to stay live
    # across the reduction (matters for bf16 inputs / VMEM pressure).
    o_ref[...] = (x_ref[...].astype(jnp.float32) * scale + beta).astype(o_ref.dtype)


def grn_sumsq_kernel(x_ref, ss_ref, *, hw, tile_hw):
    # Tiled pass 1: per-(batch, tile) partial sum of squares.
    # x_ref: (1, C, tile_hw); ss_ref: (1, 1, C, 1). Ragged last tile is masked.
    x = x_ref[...].astype(jnp.float32)
    if hw % tile_hw != 0:
        t = pl.program_id(1)
        lane = jax.lax.broadcasted_iota(jnp.int32, x.shape, dimension=2)
        x = jnp.where(lane < (hw - t * tile_hw), x, 0.0)
    ss_ref[...] = jnp.sum(x * x, axis=-1, keepdims=True).reshape(ss_ref.shape)


def grn_apply_kernel(x_ref, scale_ref, beta_ref, o_ref):
    # Tiled pass 2: pure FMA. scale/beta are (1, C, 1) f32; out-of-bounds lanes of a
    # ragged boundary tile are dropped by Pallas' masked writes.
    x = x_ref[...].astype(jnp.float32)
    o_ref[...] = (x * scale_ref[...] + beta_ref[...]).astype(o_ref.dtype)


# ----------------------------------------------------------------------------
# Wrapper
# ----------------------------------------------------------------------------
def grn_channels_first(x, gamma, beta, *, force_tiled=False, tile_hw=None):
    """x: (N, C, H, W); gamma, beta: (1, C, 1, 1). Returns (N, C, H, W)."""
    N, C, H, W = x.shape
    HW = H * W
    itemsize = jnp.dtype(x.dtype).itemsize

    x3 = x.reshape(N, C, HW)                       # contiguous merge -> free
    g3 = gamma.reshape(1, C, 1).astype(jnp.float32)
    b3 = beta.reshape(1, C, 1).astype(jnp.float32)

    vmem_cap, num_cores = _tpu_hw_info()

    # ---- Generation-aware budgets -------------------------------------------
    # Single-slab live bytes per grid step: in + out (1, C, HW) blocks (double-
    # buffered unless the grid has a single step) plus one f32 compute temp.
    slab_bytes = C * HW * itemsize
    buffering = 1 if N == 1 else 2
    slab_live = buffering * 2 * slab_bytes + C * HW * 4
    # ~40 MiB on v7x (64 MiB VMEM), ~100 MiB on v5e/v6e (128 MiB VMEM).
    slab_budget = min((vmem_cap * 25) // 32, vmem_cap - (24 << 20))

    # ---- Tiled-path tile selection (lane-dense, as large as the budget allows)
    tiled_budget = (vmem_cap * 3) // 8             # ~24 MiB v7x, ~48 MiB v5e/v6e
    per_lane_bytes = C * (4 * itemsize + 4)        # dbl-buffered in+out + f32 temp
    hw_pad = pl.cdiv(HW, 128) * 128
    if tile_hw is None:
        tile_hw = (tiled_budget // per_lane_bytes) // 128 * 128
    else:
        assert tile_hw % 128 == 0, "tile_hw must be a multiple of 128"
    tile_hw = max(128, min(int(tile_hw), hw_pad))
    n_tiles = pl.cdiv(HW, tile_hw)

    # v7x has 2 TensorCores; a batch-1 single-slab call leaves one (and half the HBM
    # bandwidth) idle, while the tiled path's (parallel, parallel) grids shard.
    route_small_batch = (N == 1) and (num_cores >= 2) and (n_tiles >= 2)
    use_tiled = force_tiled or (slab_live > slab_budget) or route_small_batch

    if not use_tiled:
        # ---------------- Single-slab fused path ----------------
        vmem_limit = int(max(min(slab_live + (16 << 20), vmem_cap - (8 << 20)),
                             32 << 20))
        big_kwargs = {"pipeline_mode": pl.Buffered(1)} if N == 1 else {}
        x_spec = pl.BlockSpec((1, C, HW), lambda n: (n, 0, 0), **big_kwargs)
        o_spec = pl.BlockSpec((1, C, HW), lambda n: (n, 0, 0), **big_kwargs)
        cost = pl.CostEstimate(flops=5 * N * C * HW, transcendentals=N * C,
                               bytes_accessed=2 * N * C * HW * itemsize)
        out3 = pl.pallas_call(
            grn_fused_kernel,
            out_shape=jax.ShapeDtypeStruct((N, C, HW), x.dtype),
            grid_spec=pltpu.PrefetchScalarGridSpec(
                num_scalar_prefetch=0,
                grid=(N,),
                in_specs=[x_spec,
                          pl.BlockSpec((1, C, 1), lambda n: (0, 0, 0)),
                          pl.BlockSpec((1, C, 1), lambda n: (0, 0, 0))],
                out_specs=o_spec,
            ),
            compiler_params=pltpu.CompilerParams(
                dimension_semantics=("parallel",),
                vmem_limit_bytes=vmem_limit),
            cost_estimate=cost,
        )(x3, g3, b3)
        return out3.reshape(N, C, H, W)

    # ---------------- Two-pass tiled path ----------------
    pass1_live = 2 * C * tile_hw * itemsize + C * tile_hw * 4
    pass2_live = 4 * C * tile_hw * itemsize + C * tile_hw * 4
    vmem_limit = int(max(min(max(pass1_live, pass2_live) + (16 << 20),
                             vmem_cap - (8 << 20)), 32 << 20))

    # Pass 1: per-(batch, tile) partial sum of squares. No resident accumulator ->
    # both grid axes are "parallel" (shards across both TCs on v7x even at N == 1).
    sumsq_kernel = functools.partial(grn_sumsq_kernel, hw=HW, tile_hw=tile_hw)
    partial_ss = pl.pallas_call(
        sumsq_kernel,
        out_shape=jax.ShapeDtypeStruct((N, n_tiles, C, 1), jnp.float32),
        grid_spec=pltpu.PrefetchScalarGridSpec(
            num_scalar_prefetch=0,
            grid=(N, n_tiles),
            in_specs=[pl.BlockSpec((1, C, tile_hw), lambda n, t: (n, 0, t))],
            out_specs=pl.BlockSpec((1, 1, C, 1), lambda n, t: (n, t, 0, 0)),
        ),
        compiler_params=pltpu.CompilerParams(
            dimension_semantics=("parallel", "parallel"),
            vmem_limit_bytes=vmem_limit),
        cost_estimate=pl.CostEstimate(flops=2 * N * C * HW, transcendentals=0,
                                      bytes_accessed=N * C * HW * itemsize),
    )(x3)

    # Tiny (N, C) epilogue at JAX level: fold tiles, sqrt, cross-channel mean, and
    # fold gamma into a single per-(n, c) scale so the apply pass is a pure FMA.
    sumsq = jnp.sum(partial_ss, axis=1)                        # (N, C, 1) f32
    gx = jnp.sqrt(sumsq)
    nx = gx / (jnp.mean(gx, axis=1, keepdims=True) + 1e-6)
    scale = g3 * nx + 1.0                                      # (N, C, 1) f32

    # Pass 2: out = x * scale + beta per HW tile; both grid axes independent.
    out3 = pl.pallas_call(
        grn_apply_kernel,
        out_shape=jax.ShapeDtypeStruct((N, C, HW), x.dtype),
        grid_spec=pltpu.PrefetchScalarGridSpec(
            num_scalar_prefetch=0,
            grid=(N, n_tiles),
            in_specs=[pl.BlockSpec((1, C, tile_hw), lambda n, t: (n, 0, t)),
                      pl.BlockSpec((1, C, 1), lambda n, t: (n, 0, 0)),
                      pl.BlockSpec((1, C, 1), lambda n, t: (0, 0, 0))],
            out_specs=pl.BlockSpec((1, C, tile_hw), lambda n, t: (n, 0, t)),
        ),
        compiler_params=pltpu.CompilerParams(
            dimension_semantics=("parallel", "parallel"),
            vmem_limit_bytes=vmem_limit),
        cost_estimate=pl.CostEstimate(flops=2 * N * C * HW, transcendentals=0,
                                      bytes_accessed=2 * N * C * HW * itemsize),
    )(x3, scale, b3)
    return out3.reshape(N, C, H, W)


# ----------------------------------------------------------------------------
# Pure-JAX reference mirroring the PyTorch channels_first forward.
# ----------------------------------------------------------------------------
def grn_reference(x, gamma, beta):
    xf = x.astype(jnp.float32)
    gx = jnp.sqrt(jnp.sum(xf * xf, axis=(2, 3), keepdims=True))   # (N, C, 1, 1)
    nx = gx / (jnp.mean(gx, axis=1, keepdims=True) + 1e-6)
    return (gamma * (xf * nx) + beta + xf).astype(x.dtype)


if __name__ == "__main__":
    key = jax.random.PRNGKey(0)
    keys = jax.random.split(key, 6)

    # Case 1: N=2, C=4, 16x16 (HW=256, lane-aligned) -> fused single-slab path.
    N, C, H, W = 2, 4, 16, 16
    x = jax.random.normal(keys[0], (N, C, H, W), dtype=jnp.float32)
    # Module __init__ uses zeros for gamma/beta; use small nonzero values so the
    # kernel math is actually exercised.
    gamma = 0.1 * jax.random.normal(keys[1], (1, C, 1, 1), dtype=jnp.float32)
    beta = 0.1 * jax.random.normal(keys[2], (1, C, 1, 1), dtype=jnp.float32)
    out = jax.block_until_ready(grn_channels_first(x, gamma, beta))
    ref = grn_reference(x, gamma, beta)
    assert out.shape == (N, C, H, W)
    assert jnp.allclose(out, ref, atol=2e-5, rtol=2e-5), "single-slab mismatch"

    # Case 2: same inputs, forced two-pass tiled path (2 even HW tiles).
    out_t = jax.block_until_ready(
        grn_channels_first(x, gamma, beta, force_tiled=True, tile_hw=128))
    assert jnp.allclose(out_t, ref, atol=2e-5, rtol=2e-5), "tiled path mismatch"

    # Case 3: HW = 200 (not a multiple of 128) -> single-slab path with NO wrapper
    # padding/slicing; only the final partial vreg column uses masked stores.
    N2, C2, H2, W2 = 2, 8, 10, 20
    x2 = jax.random.normal(keys[3], (N2, C2, H2, W2), dtype=jnp.float32)
    gamma2 = 0.1 * jax.random.normal(keys[4], (1, C2, 1, 1), dtype=jnp.float32)
    beta2 = 0.1 * jax.random.normal(keys[5], (1, C2, 1, 1), dtype=jnp.float32)
    out2 = jax.block_until_ready(grn_channels_first(x2, gamma2, beta2))
    ref2 = grn_reference(x2, gamma2, beta2)
    assert out2.shape == (N2, C2, H2, W2)
    assert jnp.allclose(out2, ref2, atol=2e-5, rtol=2e-5), "unpadded single-slab mismatch"

    # Case 4: same shape, forced tiled with a ragged last tile (200 = 128 + 72)
    # -> exercises the in-kernel lane mask and boundary-block writes.
    out2_t = jax.block_until_ready(
        grn_channels_first(x2, gamma2, beta2, force_tiled=True, tile_hw=128))
    assert jnp.allclose(out2_t, ref2, atol=2e-5, rtol=2e-5), "ragged tiled mismatch"

    # Case 5: batch-1 single-slab path (single-buffered big blocks via pl.Buffered(1)).
    x1 = x[:1]
    out1 = jax.block_until_ready(grn_channels_first(x1, gamma, beta))
    ref1 = grn_reference(x1, gamma, beta)
    assert jnp.allclose(out1, ref1, atol=2e-5, rtol=2e-5), "batch-1 mismatch"

    # Case 6: bf16 activations through the fused path (f32 compute, bf16 store).
    xb = x.astype(jnp.bfloat16)
    outb = jax.block_until_ready(grn_channels_first(xb, gamma, beta))
    refb = grn_reference(xb, gamma, beta)
    assert outb.dtype == jnp.bfloat16
    assert jnp.allclose(outb.astype(jnp.float32), refb.astype(jnp.float32),
                        atol=3e-2, rtol=3e-2), "bf16 mismatch"

    print("KERNEL_OK")
</pallas_src>

<mosaic_0001>
module attributes {stable_mosaic.version = 11 : i64} {
  func.func @grn_fused_kernel(%arg0: i32, %arg1: memref<1x4x256xf32, #tpu.memory_space<vmem>>, %arg2: memref<1x4x1xf32, #tpu.memory_space<vmem>>, %arg3: memref<1x4x1xf32, #tpu.memory_space<vmem>>, %arg4: memref<1x4x256xf32, #tpu.memory_space<vmem>>) attributes {dimension_semantics = [#tpu.dimension_semantics<parallel>], iteration_bounds = array<i64: 2>, scalar_prefetch = 0 : i64, scratch_operands = 0 : i64, tpu.core_type = #tpu.core_type<tc>, window_params = [{transform_indices = @transform_0, window_bounds = array<i64: 1, 4, 256>}, {pipeline_mode = #tpu.pipeline_mode<synchronous>, transform_indices = @transform_1, window_bounds = array<i64: 1, 4, 1>}, {pipeline_mode = #tpu.pipeline_mode<synchronous>, transform_indices = @transform_2, window_bounds = array<i64: 1, 4, 1>}, {transform_indices = @transform_3, window_bounds = array<i64: 1, 4, 256>}]} {
    %c0 = arith.constant 0 : index
    %c0_0 = arith.constant 0 : index
    %c0_1 = arith.constant 0 : index
    %0 = vector.load %arg1[%c0, %c0_0, %c0_1] : memref<1x4x256xf32, #tpu.memory_space<vmem>>, vector<1x4x256xf32>
    %1 = arith.mulf %0, %0 : vector<1x4x256xf32>
    %cst = arith.constant dense<0.000000e+00> : vector<1x4xf32>
    %2 = vector.multi_reduction <add>, %1, %cst [2] : vector<1x4x256xf32> to vector<1x4xf32>
    %3 = vector.shape_cast %2 : vector<1x4xf32> to vector<1x4x1xf32>
    %4 = math.sqrt %3 : vector<1x4x1xf32>
    %cst_2 = arith.constant dense<0.000000e+00> : vector<1x1xf32>
    %5 = vector.multi_reduction <add>, %4, %cst_2 [1] : vector<1x4x1xf32> to vector<1x1xf32>
    %6 = vector.shape_cast %5 : vector<1x1xf32> to vector<1x1x1xf32>
    %cst_3 = arith.constant 4.000000e+00 : f32
    %7 = vector.broadcast %cst_3 : f32 to vector<1x1x1xf32>
    %8 = arith.divf %6, %7 : vector<1x1x1xf32>
    %cst_4 = arith.constant 9.99999997E-7 : f32
    %9 = vector.broadcast %cst_4 : f32 to vector<1x1x1xf32>
    %10 = arith.addf %8, %9 : vector<1x1x1xf32>
    %11 = vector.broadcast %10 : vector<1x1x1xf32> to vector<1x4x1xf32>
    %12 = arith.divf %4, %11 : vector<1x4x1xf32>
    %c0_5 = arith.constant 0 : index
    %c0_6 = arith.constant 0 : index
    %c0_7 = arith.constant 0 : index
    %13 = vector.load %arg2[%c0_5, %c0_6, %c0_7] : memref<1x4x1xf32, #tpu.memory_space<vmem>>, vector<1x4x1xf32>
    %14 = arith.mulf %13, %12 : vector<1x4x1xf32>
    %cst_8 = arith.constant 1.000000e+00 : f32
    %15 = vector.broadcast %cst_8 : f32 to vector<1x4x1xf32>
    %16 = arith.addf %14, %15 : vector<1x4x1xf32>
    %c0_9 = arith.constant 0 : index
    %c0_10 = arith.constant 0 : index
    %c0_11 = arith.constant 0 : index
    %17 = vector.load %arg3[%c0_9, %c0_10, %c0_11] : memref<1x4x1xf32, #tpu.memory_space<vmem>>, vector<1x4x1xf32>
    %c0_12 = arith.constant 0 : index
    %c0_13 = arith.constant 0 : index
    %c0_14 = arith.constant 0 : index
    %18 = vector.load %arg1[%c0_12, %c0_13, %c0_14] : memref<1x4x256xf32, #tpu.memory_space<vmem>>, vector<1x4x256xf32>
    %19 = vector.broadcast %16 : vector<1x4x1xf32> to vector<1x4x256xf32>
    %20 = arith.mulf %18, %19 : vector<1x4x256xf32>
    %21 = vector.broadcast %17 : vector<1x4x1xf32> to vector<1x4x256xf32>
    %22 = arith.addf %20, %21 : vector<1x4x256xf32>
    %c0_15 = arith.constant 0 : index
    %c0_16 = arith.constant 0 : index
    %c0_17 = arith.constant 0 : index
    %23 = vector.load %arg4[%c0_15, %c0_16, %c0_17] : memref<1x4x256xf32, #tpu.memory_space<vmem>>, vector<1x4x256xf32>
    tpu.vector_store %arg4[%c0_15, %c0_16, %c0_17], %22 {strides = array<i32>} : memref<1x4x256xf32, #tpu.memory_space<vmem>>, vector<1x4x256xf32>,
    return
  }
  func.func @transform_0(%arg0: i32) -> (i32, i32, i32) {
    %c0_i32 = arith.constant 0 : i32
    %c0_i32_0 = arith.constant 0 : i32
    %c0_i32_1 = arith.constant 0 : i32
    return %arg0, %c0_i32, %c0_i32_0 : i32, i32, i32
  }
  func.func @transform_1(%arg0: i32) -> (i32, i32, i32) {
    %c0_i32 = arith.constant 0 : i32
    %c0_i32_0 = arith.constant 0 : i32
    %c0_i32_1 = arith.constant 0 : i32
    %c0_i32_2 = arith.constant 0 : i32
    return %c0_i32, %c0_i32_0, %c0_i32_1 : i32, i32, i32
  }
  func.func @transform_2(%arg0: i32) -> (i32, i32, i32) {
    %c0_i32 = arith.constant 0 : i32
    %c0_i32_0 = arith.constant 0 : i32
    %c0_i32_1 = arith.constant 0 : i32
    %c0_i32_2 = arith.constant 0 : i32
    return %c0_i32, %c0_i32_0, %c0_i32_1 : i32, i32, i32
  }
  func.func @transform_3(%arg0: i32) -> (i32, i32, i32) {
    %c0_i32 = arith.constant 0 : i32
    %c0_i32_0 = arith.constant 0 : i32
    %c0_i32_1 = arith.constant 0 : i32
    return %arg0, %c0_i32, %c0_i32_0 : i32, i32, i32
  }
}

</mosaic_0001>

<bundles_post_ra>
// kernel: tpu_custom_call.1
= control target key start
LH: loop header
LB: loop body
LE: loop exit
PB: predicated region body
PF: predicated region fallthrough
CT: control target
= control target key end

     0   :  { %8 = vsyncpa [#allocation3], 0  ;;  %s699_s0 = inlined_call_operand.hbm [shape: f32[2,4,256], index: 0, kind: input, shape index: {}]   ;;  %s700_s1 = inlined_call_operand.vmem [shape: f32[1,4,1], index: 1, kind: input, shape index: {}]   ;;  %s701_s2 = inlined_call_operand.vmem [shape: f32[1,4,1], index: 2, kind: input, shape index: {}]   ;;  %s702_s3 = inlined_call_operand.hbm [shape: f32[2,4,256], index: 3, kind: output, shape index: {}]  }
   0x1   :  { %10 = vsyncpa [#allocation3 + $0x1], 0 }
   0x2   :  { %11 = vsyncpa [#allocation4], 0 }
   0x3   :  { %13 = vsyncpa [#allocation4 + $0x1], 0  ;;  %s525_s12 = smov 0   ;;  %s527_s13 = smov 0  }
   0x4   :  { %s529_s14 = smov 0   ;;  %s531_s15 = smov 0  }
   0x5 LB: > { %s546_s16 = sadd.s32 4294967295, %s499_s15   ;;  %s333_s17 = sadd.s32 4294967294, %s499_s15   ;;  %s499_s15 = sphi %s531_s15, %s717_s15   ;;  %s495_s14 = sphi %s529_s14, %s716_s14   ;;  %s491_s13 = sphi %s527_s13, %s715_s13   ;;  %s487_s12 = sphi %s525_s12, %s714_s12  }
   0x6   : > { %s550_s18 = sadd.s32 1, %s499_s15   ;;  %s26_s19 = sadd.s32 1, %s495_s14 }
   0x7   : > { %s23_s20 = ssub.s32 %s499_s15, %s550_s18  ;;  %p33_p0 = scmp.ne.s32.totalorder %s495_s14, %s491_s13 }
   0x8   : > { %p24_p1 = scmp.eq.s32.totalorder %s23_s20, 0  ;;  %p34_p2 = scmp.eq.s32.totalorder %s499_s15, 0 }
   0x9   : > { %p39_p3 = scmp.ne.s32.totalorder %s491_s13, %s487_s12  ;;  %p40_p4 = scmp.eq.s32.totalorder %s546_s16, 0 }
   0xa   : > { %s562_s21 = scalar_select %p24_p1, %s495_s14, %s26_s19  }
   0xb   : > { %p564_p5 = por %p34_p2, %p33_p0  ;;  %p568_p6 = por %p40_p4, %p39_p3 }
   0xc   : > { %p105_p7 = scmp.eq.s32.totalorder %s546_s16, 1  ;;  %p111_p8 = scmp.eq.s32.totalorder %s333_s17, 1 }
   0xd   : > { %p361_p10 = scmp.lt.s32.totalorder %s499_s15, 2  ;;  %s137_s26 = sand.u32 1, %s495_s14  }
   0xe   : > { %p575_p11 = por %p105_p7, %p33_p0  ;;  %p579_p12 = por %p111_p8, %p39_p3 }
   0xf   : > { %s347_s27 = sshll.u32 %s499_s15, 7  ;;  %s336_s28 = sshll.u32 %s137_s26, 3 }
  0x10   : > { %s706_s24 = scalar_select %p575_p11, 1, 0 }
  0x11   : > { %s707_s25 = scalar_select %p579_p12, 1, 0 }
  0x12   : > { %s588_s4 = scalar_lea.hbm %s699_s0, %s347_s27  ;;  %s141_s5 = scalar_lea.vmem [#allocation2], %s336_s28 }
  0x13   : > { %s149_s6 = sshll.u32 %s141_s5, 4  ;;  %p592_p13 = pnand %p361_p10, %p564_p5  ;;  %s596_s6 = int_to_ptr.vmem [resolvable:$true] %s149_s6 }
  0x14   : > { %s138_s8 = scalar_lea.sflag [#allocation3], %s137_s26  ;;  %s403_s9 = scalar_lea.hbm %s588_s4, 128 }
  0x15   : > { %p404_p2 = scmp.ne.s32.totalorder %s588_s4, %s403_s9  ;;  %p405_p3 = pneg %p592_p13 }
  0x16   : > { %s408_s17 = scalar_lea.hbm %s699_s0, 256  ;;  %p409_p5 = scmp.lt.u32.totalorder %s588_s4, %s699_s0 }
  0x17   : > { %p406_p4 = pnand %p405_p3, %p404_p2  ;;  %p410_p8 = scmp.lt.u32.totalorder %s408_s17, %s403_s9 }
  0x18   : > { %p412_p9 = scmp.lt.u32.totalorder %s403_s9, %s588_s4 }
  0x19   : > { %p407_p7 = pneg %p406_p4  ;;  %p411_p10 = por %p410_p8, %p409_p5 }
  0x1b   : > { %p413_p0 = por %p412_p9, %p411_p10 }
  0x1d   : > { %p414_p1 = pnand %p413_p0, %p407_p7 }
  0x1f   : > { %417 = shalt.err (!%p414_p1)
}
  0x20   : > { %s418_s22 = scalar_lea.vmem %s596_s6, 128  ;;  %s501_s26 = smov [#allocation2]  }
  0x21   : > { %p419_p2 = scmp.ne.s32.totalorder %s596_s6, %s418_s22  ;;  %s423_s27 = sshll.u32 %s501_s26, 4  ;;  %s424_s27 = int_to_ptr.vmem [resolvable:$false] %s423_s27 }
  0x22   : > { %s425_s28 = scalar_lea.vmem %s424_s27, 256  ;;  %p426_p11 = scmp.lt.s32.totalorder %s596_s6, %s424_s27 }
  0x23   : > { %p421_p4 = pnand %p419_p2, %p405_p3  ;;  %p427_p5 = scmp.lt.s32.totalorder %s425_s28, %s418_s22 }
  0x25   : > { %p422_p12 = pneg %p421_p4  ;;  %p428_p8 = por %p427_p5, %p426_p11 }
  0x27   : > { %p429_p9 = pnand %p428_p8, %p422_p12 }
  0x29   : > { %432 = shalt.err (!%p429_p9)
}
  0x2a   : > { %356 = dma.hbm_to_vmem [thread:$0]  (!%p592_p13), %s588_s4, 128, %s596_s6, %s138_s8  }
  0x2b   : > { %p709_p0 = scmp.lt.s32.totalorder %s499_s15, 3  ;;  %p710_p1 = scmp.ge.s32.totalorder %s499_s15, 1 }
  0x2d   : > { %p155_p3 = pnand %p710_p1, %p709_p0 }
  0x2e   : > { %s630_s29 = sand.u32 (!%p155_p3), 1, %s491_s13  }
  0x2f   : > { %158 = sbr.rel (%p155_p3) target bundleno = 402 (0x192), region = 32  ;;  %s340_s30 = sshll.u32 (!%p155_p3), %s630_s29, 3 }
  0x30   : > { %s161_s5 = scalar_lea.sflag (!%p155_p3), [#allocation3], %s630_s29  ;;  %s164_s7 = scalar_lea.vmem (!%p155_p3), [#allocation2], %s340_s30 }
  0x36   : > { %478 = dma.done.wait (%p568_p6), %s161_s5, 128  }
  0x37   : > { %480 = vsyncadd (%p568_p6), %s161_s5, 4294967168  ;;  %v187_v0 = vld [vmem:[%s164_s7] sm:$0xff]  ;;  %vm192_vm0 = vcmask 1043456   ;;  %v502_v6 = vmov 0   ;;  %v503_v28 = vmov 839922192   ;;  %v228_v30 = vlaneseq }
  0x38   : > { %v188_v1 = vmul.f32 %v187_v0, %v187_v0  ;;  %397 = vset.pattern.permute.xlu0 %v502_v6  ;;  %398 = vset.pattern.permute.xlu1 %v502_v6  ;;  %v220_v7 = vld [vmem:[%s701_s2] sm:$0xf]  ;;  %v226_v29 = vunpack.c.l.s4 %v503_v28  ;;  %s348_s9 = sshll.u32 %s546_s16, 7  ;;  %s186_s10 = scalar_lea.vmem [#allocation5], %s340_s30 }
  0x39   : > { %236 = vperm.xlu1 %398, %v220_v7   ;;  %v217_v24 = vld [vmem:[%s700_s1] sm:$0xf]  ;;  %v229_v32 = vshrl.u32 %v228_v30, 7  ;;  %s263_s11 = sshll.u32 %s186_s10, 4  ;;  %s655_s20 = scalar_lea.hbm %s702_s3, %s348_s9  ;;  %s657_s11 = int_to_ptr.vmem [resolvable:$true] %s263_s11 }
  0x3a   : > { %v190_v2 = vcombine.high %v188_v1, %v188_v1  ;;  %v193_v3 = vsel %vm192_vm0, %v188_v1, 0.0  ;;  %v227_v31 = vunpack.c.0.s8 %v226_v29  ;;  %s249_s22 = scalar_lea.sflag [#allocation4], %s630_s29  ;;  %s433_s26 = scalar_lea.vmem %s657_s11, 128 }
  0x3b   : > { %p434_p6 = scmp.ne.s32.totalorder %s657_s11, %s433_s26  ;;  %p711_p11 = scmp.ne.s32.totalorder %s706_s24, 0 }
  0x3c   : > { %v194_v4 = vsel %vm192_vm0, %v190_v2, 0.0  ;;  %v230_v33 = vsub.s32 %v227_v31, %v229_v32  ;;  %s504_s16 = smov [#allocation5]  }
  0x3d   : > { %v195_v5 = vadd.f32 %v194_v4, %v193_v3  ;;  %p435_p12 = pnand %p434_p6, %p711_p11  ;;  %s437_s27 = sshll.u32 %s504_s16, 4  ;;  %s438_s27 = int_to_ptr.vmem [resolvable:$false] %s437_s27 }
  0x3e   : > { %s439_s28 = scalar_lea.vmem %s438_s27, 256  ;;  %p440_p7 = scmp.lt.s32.totalorder %s657_s11, %s438_s27 }
  0x3f   : > { %196 = vadd.xlane.f32.xlu0 %v195_v5  ;;  %p436_p13 = pneg %p435_p12  ;;  %p441_p10 = scmp.lt.s32.totalorder %s439_s28, %s433_s26 }
  0x41   : > { %p442_p2 = por %p441_p10, %p440_p7 }
  0x43   : > { %p443_p4 = pnand %p442_p2, %p436_p13 }
  0xb8   : > { %v237_v34 = vpop.permute.xlu1 %236 }
  0xb9   : > { %v244_v37 = vrot.slane %v237_v34, %v230_v33 }
  0xcc   : > { %v197_v8 = vpop.xlane.xlu0 %196 }
  0xcd   : > { %399 = vrsqrt.f32 %v197_v8  ;;  %vm200_vm1 = vcmp.eq.f32.partialorder %v197_v8, inf  ;;  %v203_v11 = vand.u32 2147483648, %v197_v8  ;;  %vm202_vm2 = vcmp.eq.f32.partialorder %v197_v8, 0.0 }
  0xd7   : > { %v400_v9 = vpop.eup %399 }
  0xd8   : > { %v199_v10 = vmul.f32 %v400_v9, %v197_v8 }
  0xda   : > { %v201_v12 = vsel %vm200_vm1, %v197_v8, %v199_v10 }
  0xdb   : > { %v204_v13 = vsel %vm202_vm2, %v203_v11, %v201_v12 }
  0xdc   : > { %v205_v14 = vsel %vm192_vm0, %v204_v13, 0.0 }
  0xdd   : > { %v206_v15 = vrot.slane %v205_v14, 4 }
  0xdf   : > { %v207_v16 = vadd.f32 %v206_v15, %v205_v14 }
  0xe1   : > { %v208_v17 = vrot.slane %v207_v16, 2 }
  0xe3   : > { %v209_v18 = vadd.f32 %v208_v17, %v207_v16 }
  0xe5   : > { %v210_v19 = vrot.slane %v209_v18, 1 }
  0xe7   : > { %v211_v20 = vadd.f32 %v210_v19, %v209_v18 }
  0xe9   : > { %v213_v21 = vmul.f32 0.25, %v211_v20 }
  0xeb   : > { %v214_v22 = vadd.f32 1e-06, %v213_v21 }
  0xed   : > { %401 = vrcp.f32 %v214_v22 }
  0xf7   : > { %v402_v23 = vpop.eup %401 }
  0xf8   : > { %v216_v25 = vmul.f32 %v402_v23, %v204_v13 }
  0xfa   : > { %v218_v26 = vmul.f32 %v217_v24, %v216_v25 }
  0xfc   : > { %v219_v27 = vadd.f32 1.0, %v218_v26 }
  0xfe   : > { %223 = vperm.xlu0 %397, %v219_v27  }
 0x17d   : > { %v224_v35 = vpop.permute.xlu0 %223 }
 0x17e   : > { %v231_v36 = vrot.slane %v224_v35, %v230_v33 }
 0x180   : > { %v233_v38 = vmul.f32 %v231_v36, %v187_v0 }
 0x182   : > { %v246_v39 = vadd.f32 %v244_v37, %v233_v38 }
 0x184   : > { %247 = vst [vmem:[%s186_s10] sm:$0xff] %v246_v39 }
 0x185   : > { %446 = shalt.err (!%p443_p4)
}
 0x186   : > { %s447_s29 = scalar_lea.hbm %s655_s20, 128  ;;  %s451_s7 = scalar_lea.hbm %s702_s3, 256 }
 0x187   : > { %p448_p5 = scmp.ne.s32.totalorder %s655_s20, %s447_s29  ;;  %p452_p0 = scmp.lt.u32.totalorder %s655_s20, %s702_s3 }
 0x188   : > { %p453_p1 = scmp.lt.u32.totalorder %s451_s7, %s447_s29  ;;  %p455_p6 = scmp.lt.u32.totalorder %s447_s29, %s655_s20 }
 0x189   : > { %p449_p8 = pnand %p448_p5, %p711_p11 }
 0x18a   : > { %p454_p3 = por %p453_p1, %p452_p0 }
 0x18b   : > { %p450_p9 = pneg %p449_p8 }
 0x18c   : > { %p456_p12 = por %p455_p6, %p454_p3 }
 0x18e   : > { %p457_p13 = pnand %p456_p12, %p450_p9 }
 0x190   : > { %460 = shalt.err (!%p457_p13)
}
 0x191   : > { %351 = dma.vmem_to_hbm [thread:$0]  (%p711_p11), %s657_s11, 128, %s655_s20, %s249_s22  }
 0x192 PF: > { %s275_s23 = sand.u32 1, %s487_s12   ;;  %p712_p7 = scmp.ne.s32.totalorder %s707_s25, 0 }
 0x193   : > { %p713_p10 = scmp.ge.s32.totalorder %s499_s15, 2  ;;  %s276_s8 = scalar_lea.sflag [#allocation4], %s275_s23 }
 0x195   : > { %p358_p2 = pnand %p713_p10, %p712_p7 }
 0x197   : > { %482 = dma.done.wait (!%p358_p2), %s276_s8, 128  }
 0x198   : > { %484 = vsyncadd (!%p358_p2), %s276_s8, 4294967168  ;;  %p16_p4 = scmp.ge.s32.totalorder %s550_s18, 4   ;;  %s714_s12 = smov %s491_s13 }
 0x199   : > { %s715_s13 = smov %s495_s14  ;;  %s716_s14 = smov %s562_s21 }
 0x19a   : > { %s717_s15 = smov %s550_s18  ;;  %18 = sbr.rel (!%p16_p4) target bundleno = 5 (0x5), region = 77 }
 0x1a1   :  { %281 = vsyncpa [#allocation3], 1 }
 0x1a2   :  { %283 = vsyncpa [#allocation3 + $0x1], 1 }
 0x1a3   :  { %284 = vsyncpa [#allocation4], 1 }
 0x1a4   :  { %286 = vsyncpa [#allocation4 + $0x1], 1 }

</bundles_post_ra>
